<compile_context>
chip_gen: v5e
topology: v5e:2x2
jax: 0.10.0
libtpu: 0.0.40
codegen_flags: <defaults>
</compile_context>

<pallas_src>
import math

import jax
import jax.numpy as jnp
from jax.experimental import pallas as pl
from jax.experimental.pallas import tpu as pltpu


def _round_up(x: int, m: int) -> int:
    return ((x + m - 1) // m) * m


# ----------------------------------------------------------------------------
# Kernels
# ----------------------------------------------------------------------------

def _linear_noacc_kernel(x_ref, w_ref, b_ref, o_ref):
    # Single-K fast path: x_ref (tm, Kp), w_ref (Kp, tn), b_ref (1, tn).
    o_ref[...] = (
        jnp.dot(x_ref[...], w_ref[...], preferred_element_type=jnp.float32)
        + b_ref[...].astype(jnp.float32)
    ).astype(o_ref.dtype)


def _linear_acc_kernel(x_ref, w_ref, b_ref, o_ref, acc_ref):
    # K-tiled path: grid (Mtiles, Ntiles, Ktiles), K innermost ("arbitrary").
    k = pl.program_id(2)
    partial = jnp.dot(x_ref[...], w_ref[...], preferred_element_type=jnp.float32)

    @pl.when(k == 0)
    def _():
        acc_ref[...] = partial          # first-step assignment (no zero-fill)

    @pl.when(k != 0)
    def _():
        acc_ref[...] += partial

    @pl.when(k == pl.num_programs(2) - 1)
    def _():
        o_ref[...] = (acc_ref[...] + b_ref[...].astype(jnp.float32)).astype(o_ref.dtype)


# ----------------------------------------------------------------------------
# Tile selection: maximize tiles / minimize modeled HBM traffic within budget.
# ----------------------------------------------------------------------------

def _choose_tiles(M, N, K, itemsize, budget):
    Mp8 = _round_up(max(M, 1), 8)
    Np128 = _round_up(max(N, 1), 128)
    Kp128 = _round_up(max(K, 1), 128)

    tm_cands = sorted({min(t, Mp8) for t in (128, 256, 512, 1024)}, reverse=True)
    tn_cands = sorted({min(t, Np128) for t in (128, 256, 512, 1024)}, reverse=True)
    tk_cands = sorted({min(t, Kp128) for t in (128, 256, 512, 1024, 2048, Kp128)},
                      reverse=True)

    best, best_key = None, None
    for tk in tk_cands:
        for tn in tn_cands:
            for tm in tm_cands:
                Mp, Np, Kp = _round_up(M, tm), _round_up(N, tn), _round_up(K, tk)
                kt = Kp // tk
                # Double-buffered x/w/bias/out blocks (+ f32 acc if K is tiled).
                vmem = 2 * (tm * tk + tk * tn + tn + tm * tn) * itemsize
                if kt > 1:
                    vmem += tm * tn * 4
                if vmem > budget:
                    continue
                # HBM traffic: x refetched per N-tile, weight per M-tile,
                # output written once.
                traffic = (Mp * Kp * (Np // tn)
                           + Kp * Np * (Mp // tm)
                           + Mp * Np) * itemsize
                key = (traffic, kt, -(tm * tn))
                if best_key is None or key < best_key:
                    best_key, best = key, (tm, tn, tk)
    if best is None:  # degenerate budget fallback
        best = (min(128, Mp8), min(128, Np128), min(128, Kp128))
    return best


# ----------------------------------------------------------------------------
# Wrapper
# ----------------------------------------------------------------------------

def equivalent_hyperbolic_linear(x, weight, bias=None, *, tiles=None,
                                 vmem_budget_bytes=12 * 1024 * 1024):
    """Forward of EquivalentHyperbolicLinear: F.linear(x, weight, bias).

    x: (..., in_features); weight: (out_features, in_features);
    bias: (out_features,) or None.
    """
    orig_shape = x.shape
    K = orig_shape[-1]
    N, Kw = weight.shape
    assert Kw == K, (Kw, K)

    x2d = x.reshape(-1, K)
    M = x2d.shape[0]

    dtypes = [x.dtype, weight.dtype] + ([bias.dtype] if bias is not None else [])
    out_dtype = jnp.result_type(*dtypes)
    itemsize = max(jnp.dtype(d).itemsize for d in dtypes + [out_dtype])

    if tiles is None:
        tm, tn, tk = _choose_tiles(M, N, K, itemsize, vmem_budget_bytes)
    else:
        tm, tn, tk = tiles
        tm = min(_round_up(tm, 8), _round_up(M, 8))
        tn = min(_round_up(tn, 128), _round_up(N, 128))
        tk = min(_round_up(tk, 128), _round_up(K, 128))

    Mp, Np, Kp = _round_up(M, tm), _round_up(N, tn), _round_up(K, tk)
    mt, nt, kt = Mp // tm, Np // tn, Kp // tk

    # One-time parameter prep (would be folded into param init in a model):
    # pre-transpose weight to (K, N) so the kernel runs a plain NN matmul.
    # TODO(synk): in a real deployment, cache the transposed/padded weight
    # across calls instead of recomputing it per forward.
    wt = weight.T
    xp = x2d if (Mp == M and Kp == K) else jnp.pad(x2d, ((0, Mp - M), (0, Kp - K)))
    wp = wt if (Kp == K and Np == N) else jnp.pad(wt, ((0, Kp - K), (0, Np - N)))
    if bias is None:
        bp = jnp.zeros((1, Np), out_dtype)
    else:
        b1 = bias.astype(out_dtype)
        bp = (b1 if Np == N else jnp.pad(b1, (0, Np - N))).reshape(1, Np)

    cost = pl.CostEstimate(
        flops=2 * M * N * K,
        transcendentals=0,
        bytes_accessed=(M * K * jnp.dtype(x.dtype).itemsize
                        + N * K * jnp.dtype(weight.dtype).itemsize
                        + M * N * jnp.dtype(out_dtype).itemsize),
    )

    if kt == 1:
        # Single-K fast path: no accumulator scratch, no init/finalize phases.
        # If the chooser also collapsed N (tn == Np), the weight block index is
        # constant across the grid, so the weight is DMAed from HBM only once.
        outp = pl.pallas_call(
            _linear_noacc_kernel,
            out_shape=jax.ShapeDtypeStruct((Mp, Np), out_dtype),
            grid_spec=pltpu.PrefetchScalarGridSpec(
                num_scalar_prefetch=0,
                grid=(mt, nt),
                in_specs=[
                    pl.BlockSpec((tm, tk), lambda i, j: (i, 0)),   # activations
                    pl.BlockSpec((tk, tn), lambda i, j: (0, j)),   # weight (K, N)
                    pl.BlockSpec((1, tn), lambda i, j: (0, j)),    # bias
                ],
                out_specs=pl.BlockSpec((tm, tn), lambda i, j: (i, j)),
            ),
            compiler_params=pltpu.CompilerParams(
                dimension_semantics=("parallel", "parallel")),
            cost_estimate=cost,
        )(xp, wp, bp)
    else:
        outp = pl.pallas_call(
            _linear_acc_kernel,
            out_shape=jax.ShapeDtypeStruct((Mp, Np), out_dtype),
            grid_spec=pltpu.PrefetchScalarGridSpec(
                num_scalar_prefetch=0,
                grid=(mt, nt, kt),
                in_specs=[
                    pl.BlockSpec((tm, tk), lambda i, j, k: (i, k)),  # activations
                    pl.BlockSpec((tk, tn), lambda i, j, k: (k, j)),  # weight (K, N)
                    pl.BlockSpec((1, tn), lambda i, j, k: (0, j)),   # bias
                ],
                out_specs=pl.BlockSpec((tm, tn), lambda i, j, k: (i, j)),
                scratch_shapes=[pltpu.VMEM((tm, tn), jnp.float32)],
            ),
            compiler_params=pltpu.CompilerParams(
                dimension_semantics=("parallel", "parallel", "arbitrary")),
            cost_estimate=cost,
        )(xp, wp, bp)

    out2d = outp[:M, :N]
    return out2d.reshape(*orig_shape[:-1], N)


def _reference(x, weight, bias):
    y = x.reshape(-1, x.shape[-1]) @ weight.T
    if bias is not None:
        y = y + bias
    return y.reshape(*x.shape[:-1], weight.shape[0])


if __name__ == "__main__":
    key = jax.random.PRNGKey(0)
    kx, kw, kb, kx2, kw2 = jax.random.split(key, 5)

    # --- Test 1: module-default small shape (batch=2, seq=8, hidden=32) -----
    in_features, out_features = 32, 32
    batch, seq = 2, 8

    # Deterministic params mirroring reset_parameters():
    # kaiming_uniform_(a=sqrt(5)) -> U(-1/sqrt(fan_in), 1/sqrt(fan_in)); bias same.
    fan_in = in_features
    bound = 1.0 / math.sqrt(fan_in)
    weight = jax.random.uniform(
        kw, (out_features, in_features), jnp.float32, -bound, bound)
    bias = jax.random.uniform(kb, (out_features,), jnp.float32, -bound, bound)
    x = jax.random.normal(kx, (batch, seq, in_features), jnp.float32)

    out = jax.block_until_ready(equivalent_hyperbolic_linear(x, weight, bias))
    ref = _reference(x, weight, bias)
    assert out.shape == (batch, seq, out_features)
    assert jnp.allclose(out, ref, atol=1e-5, rtol=1e-5), \
        float(jnp.max(jnp.abs(out - ref)))

    # --- Test 2: force the K-tiled accumulator path (kt > 1), bias=None -----
    in2, out2, m2 = 256, 96, 24
    w2 = jax.random.uniform(kw2, (out2, in2), jnp.float32, -0.1, 0.1)
    x2 = jax.random.normal(kx2, (m2, in2), jnp.float32)
    y2 = jax.block_until_ready(
        equivalent_hyperbolic_linear(x2, w2, None, tiles=(8, 128, 128)))
    r2 = _reference(x2, w2, None)
    assert y2.shape == (m2, out2)
    assert jnp.allclose(y2, r2, atol=1e-4, rtol=1e-4), \
        float(jnp.max(jnp.abs(y2 - r2)))

    print("KERNEL_OK")
</pallas_src>

<mosaic_0001>
module attributes {stable_mosaic.version = 11 : i64} {
  func.func @_linear_noacc_kernel(%arg0: i32, %arg1: i32, %arg2: memref<16x128xf32, #tpu.memory_space<vmem>>, %arg3: memref<128x128xf32, #tpu.memory_space<vmem>>, %arg4: memref<1x128xf32, #tpu.memory_space<vmem>>, %arg5: memref<16x128xf32, #tpu.memory_space<vmem>>) attributes {dimension_semantics = [#tpu.dimension_semantics<parallel>, #tpu.dimension_semantics<parallel>], iteration_bounds = array<i64: 1, 1>, scalar_prefetch = 0 : i64, scratch_operands = 0 : i64, tpu.core_type = #tpu.core_type<tc>, window_params = [{transform_indices = @transform_0, window_bounds = array<i64: 16, 128>}, {transform_indices = @transform_1, window_bounds = array<i64: 128, 128>}, {transform_indices = @transform_2, window_bounds = array<i64: 1, 128>}, {transform_indices = @transform_3, window_bounds = array<i64: 16, 128>}]} {
    %c0 = arith.constant 0 : index
    %c0_0 = arith.constant 0 : index
    %0 = vector.load %arg2[%c0, %c0_0] : memref<16x128xf32, #tpu.memory_space<vmem>>, vector<16x128xf32>
    %c0_1 = arith.constant 0 : index
    %c0_2 = arith.constant 0 : index
    %1 = vector.load %arg3[%c0_1, %c0_2] : memref<128x128xf32, #tpu.memory_space<vmem>>, vector<128x128xf32>
    %cst = arith.constant dense<0.000000e+00> : vector<16x128xf32>
    %2 = tpu.matmul %0, %1, %cst {dimension_numbers = #tpu.dot_dimension_numbers<[1], [0], [0], [1], [0, 0, 1, 1], [], []>} : vector<16x128xf32>, vector<128x128xf32>, vector<16x128xf32> -> vector<16x128xf32>
    %c0_3 = arith.constant 0 : index
    %c0_4 = arith.constant 0 : index
    %3 = vector.load %arg4[%c0_3, %c0_4] : memref<1x128xf32, #tpu.memory_space<vmem>>, vector<1x128xf32>
    %4 = vector.broadcast %3 : vector<1x128xf32> to vector<16x128xf32>
    %5 = arith.addf %2, %4 : vector<16x128xf32>
    %c0_5 = arith.constant 0 : index
    %c0_6 = arith.constant 0 : index
    %6 = vector.load %arg5[%c0_5, %c0_6] : memref<16x128xf32, #tpu.memory_space<vmem>>, vector<16x128xf32>
    tpu.vector_store %arg5[%c0_5, %c0_6], %5 {strides = array<i32>} : memref<16x128xf32, #tpu.memory_space<vmem>>, vector<16x128xf32>,
    return
  }
  func.func @transform_0(%arg0: i32, %arg1: i32) -> (i32, i32) {
    %c0_i32 = arith.constant 0 : i32
    %c0_i32_0 = arith.constant 0 : i32
    return %arg0, %c0_i32 : i32, i32
  }
  func.func @transform_1(%arg0: i32, %arg1: i32) -> (i32, i32) {
    %c0_i32 = arith.constant 0 : i32
    %c0_i32_0 = arith.constant 0 : i32
    return %c0_i32, %arg1 : i32, i32
  }
  func.func @transform_2(%arg0: i32, %arg1: i32) -> (i32, i32) {
    %c0_i32 = arith.constant 0 : i32
    %c0_i32_0 = arith.constant 0 : i32
    return %c0_i32, %arg1 : i32, i32
  }
  func.func @transform_3(%arg0: i32, %arg1: i32) -> (i32, i32) {
    %c0_i32 = arith.constant 0 : i32
    return %arg0, %arg1 : i32, i32
  }
}

</mosaic_0001>

<bundles_post_ra>
// kernel: tpu_custom_call.1
= control target key start
LH: loop header
LB: loop body
LE: loop exit
PB: predicated region body
PF: predicated region fallthrough
CT: control target
= control target key end

     0   :  { %8 = vsyncpa [#allocation3], 0  ;;  %s260_s0 = inlined_call_operand.hbm [shape: f32[16,128], index: 0, kind: input, shape index: {}]   ;;  %s261_s1 = inlined_call_operand.hbm [shape: f32[128,128], index: 1, kind: input, shape index: {}]   ;;  %s262_s2 = inlined_call_operand.vmem [shape: f32[1,128], index: 2, kind: input, shape index: {}]   ;;  %s263_s3 = inlined_call_operand.hbm [shape: f32[16,128], index: 3, kind: output, shape index: {}]  }
   0x1   :  { %9 = vsyncpa [#allocation6], 0 }
   0x2   :  { %10 = vsyncpa [#allocation4], 0  ;;  %s15_s14 = sshll.u32 %s260_s0, 4  ;;  %s214_s15 = smov [#allocation2]   ;;  %s16_s14 = int_to_ptr.hbm [resolvable:$true] %s15_s14 }
   0x3   :  { %s17_s16 = sshll.u32 %s214_s15, 4  ;;  %s28_s19 = sshll.u32 %s261_s1, 4  ;;  %s18_s16 = int_to_ptr.vmem [resolvable:$true] %s17_s16  ;;  %s29_s19 = int_to_ptr.hbm [resolvable:$true] %s28_s19 }
   0x4   :  { %s215_s20 = smov 128   ;;  %s216_s21 = smov 8  }
   0x5   :  { %23 = dma.hbm_to_vmem [thread:$0]  %s16_s14, 256, %s18_s16, [#allocation3], %s215_s20, %s215_s20, %s216_s21  }
   0x6   :  { %s217_s22 = smov [#allocation5]  }
   0x7   :  { %s30_s23 = sshll.u32 %s217_s22, 4  ;;  %s31_s23 = int_to_ptr.vmem [resolvable:$true] %s30_s23 }
   0x8   :  { %36 = dma.hbm_to_vmem [thread:$0]  %s29_s19, 2048, %s31_s23, [#allocation6], %s215_s20, %s215_s20, %s216_s21  }
   0x9   :  { %208 = dma.done.wait [#allocation3], 256  }
   0xa   :  { %209 = vsyncadd [#allocation3], 4294967040 }
   0xb   :  { %210 = dma.done.wait [#allocation6], 2048  }
   0xc   :  { %211 = vsyncadd [#allocation6], 4294965248  ;;  %v64_v0 = vld [vmem:[#allocation5 + $0x78] sm:$0xff]  ;;  %v63_v1 = vld [vmem:[#allocation5 + $0x70] sm:$0xff]  ;;  %s218_s24 = smov [#allocation7]   ;;  %s100_s28 = sshll.u32 %s263_s3, 4  ;;  %s101_s28 = int_to_ptr.hbm [resolvable:$true] %s100_s28 }
   0xd   :  { %69 = vmatpush.msra.mxu0 %v64_v0  ;;  %114 = vmatpush.msra.mxu1 %v64_v0  ;;  %v62_v2 = vld [vmem:[#allocation5 + $0x68] sm:$0xff]  ;;  %v61_v3 = vld [vmem:[#allocation5 + $0x60] sm:$0xff]  ;;  %v60_v4 = vld [vmem:[#allocation5 + $0x58] sm:$0xff]  ;;  %s98_s25 = sshll.u32 %s218_s24, 4  ;;  %s99_s25 = int_to_ptr.vmem [resolvable:$true] %s98_s25 }
   0xe   :  { %v59_v5 = vld [vmem:[#allocation5 + $0x50] sm:$0xff]  ;;  %v58_v6 = vld [vmem:[#allocation5 + $0x48] sm:$0xff]  ;;  %v57_v7 = vld [vmem:[#allocation5 + $0x40] sm:$0xff] }
   0xf   :  { %70 = vmatpush.msra.mxu0 %v63_v1  ;;  %115 = vmatpush.msra.mxu1 %v63_v1  ;;  %v56_v8 = vld [vmem:[#allocation5 + $0x38] sm:$0xff]  ;;  %v55_v9 = vld [vmem:[#allocation5 + $0x30] sm:$0xff]  ;;  %v54_v10 = vld [vmem:[#allocation5 + $0x28] sm:$0xff] }
  0x10   :  { %v53_v11 = vld [vmem:[#allocation5 + $0x20] sm:$0xff]  ;;  %v52_v12 = vld [vmem:[#allocation5 + $0x18] sm:$0xff]  ;;  %v51_v13 = vld [vmem:[#allocation5 + $0x10] sm:$0xff] }
  0x11   :  { %71 = vmatpush.msra.mxu0 %v62_v2  ;;  %116 = vmatpush.msra.mxu1 %v62_v2  ;;  %v50_v14 = vld [vmem:[#allocation5 + $0x8] sm:$0xff]  ;;  %v49_v15 = vld [vmem:[#allocation5] sm:$0xff]  ;;  %v47_v16 = vld [vmem:[#allocation2] sm:$0xff] }
  0x12   :  { %v48_v17 = vld [vmem:[#allocation2 + $0x8] sm:$0xff]  ;;  %v135_v18 = vld [vmem:[%s262_s2] ss:$0 sm:$0xff] }
  0x13   :  { %72 = vmatpush.msra.mxu0 %v61_v3  ;;  %117 = vmatpush.msra.mxu1 %v61_v3 }
  0x15   :  { %73 = vmatpush.msra.mxu0 %v60_v4  ;;  %118 = vmatpush.msra.mxu1 %v60_v4 }
  0x17   :  { %74 = vmatpush.msra.mxu0 %v59_v5  ;;  %119 = vmatpush.msra.mxu1 %v59_v5 }
  0x19   :  { %75 = vmatpush.msra.mxu0 %v58_v6  ;;  %120 = vmatpush.msra.mxu1 %v58_v6 }
  0x1b   :  { %76 = vmatpush.msra.mxu0 %v57_v7  ;;  %121 = vmatpush.msra.mxu1 %v57_v7 }
  0x1d   :  { %77 = vmatpush.msra.mxu0 %v56_v8  ;;  %122 = vmatpush.msra.mxu1 %v56_v8 }
  0x1f   :  { %78 = vmatpush.msra.mxu0 %v55_v9  ;;  %123 = vmatpush.msra.mxu1 %v55_v9 }
  0x21   :  { %79 = vmatpush.msra.mxu0 %v54_v10  ;;  %124 = vmatpush.msra.mxu1 %v54_v10 }
  0x23   :  { %80 = vmatpush.msra.mxu0 %v53_v11  ;;  %125 = vmatpush.msra.mxu1 %v53_v11 }
  0x25   :  { %81 = vmatpush.msra.mxu0 %v52_v12  ;;  %126 = vmatpush.msra.mxu1 %v52_v12 }
  0x27   :  { %82 = vmatpush.msra.mxu0 %v51_v13  ;;  %127 = vmatpush.msra.mxu1 %v51_v13 }
  0x29   :  { %83 = vmatpush.msra.mxu0 %v50_v14  ;;  %128 = vmatpush.msra.mxu1 %v50_v14 }
  0x2b   :  { %84 = vmatpush.msra.mxu0 %v49_v15  ;;  %129 = vmatpush.msra.mxu1 %v49_v15 }
  0x2c   :  { %85 = vmatmul.f32.vlgmr.msra.gmra.mxu0 %v47_v16  ;;  %88 = vmatmul.f32.vlgmr.msra.gmra.mxu1 %v48_v17 }
  0xa9   :  { %v86_v19 = vpop.f32.mrf.mxu0  ;;  %v89_v20 = vpop.f32.mrf.mxu1 }
  0xaa   :  { %v87_v21 = vadd.f32 %v135_v18, %v86_v19  ;;  %v90_v22 = vadd.f32 %v135_v18, %v89_v20 }
  0xac   :  { %92 = vst [vmem:[#allocation7] sm:$0xff] %v87_v21 }
  0xad   :  { %93 = vst [vmem:[#allocation7 + $0x8] sm:$0xff] %v90_v22 }
  0xae   :  { %106 = dma.vmem_to_hbm [thread:$0]  %s99_s25, 256, %s101_s28, [#allocation4], %s215_s20, %s215_s20, %s216_s21  }
  0xaf   :  { %212 = dma.done.wait [#allocation4], 256  }
  0xb0   :  { %213 = vsyncadd [#allocation4], 4294967040 }
  0xb1   :  { %111 = vsyncpa [#allocation3], 1 }
  0xb2   :  { %112 = vsyncpa [#allocation6], 1 }
  0xb3   :  { %113 = vsyncpa [#allocation4], 1 }

</bundles_post_ra>
